<compile_context>
chip_gen: v7x
topology: tpu7x:2x2x1
jax: 0.10.0
libtpu: 0.0.40
codegen_flags: <defaults>
</compile_context>

<pallas_src>
import functools

import jax
import jax.numpy as jnp
from jax import lax
from jax.experimental import pallas as pl
from jax.experimental.pallas import tpu as pltpu

LANE = 128  # TPU lane width; vocab axis is padded to a multiple of this.


# ----------------------------------------------------------------------------
# In-kernel helpers
# ----------------------------------------------------------------------------
def _layernorm(x, w, b, eps=1e-5):
    mu = jnp.mean(x, axis=-1, keepdims=True)
    var = jnp.mean((x - mu) * (x - mu), axis=-1, keepdims=True)
    return (x - mu) * lax.rsqrt(var + eps) * w + b


# ----------------------------------------------------------------------------
# Pallas kernel: one (batch b, layer l) grid step of the fused forward pass.
# The residual stream lives in a VMEM scratch across the layer axis.
# ----------------------------------------------------------------------------
def fused_block_kernel(
    x_ref,                        # (T, E)   token+pos embeddings for batch b (f32)
    ln1w_ref, ln1b_ref,           # (1, E)   f32
    wqkv_ref,                     # (E, 3E)  fused q|k|v weights (compute dtype)
    wproj_ref, bproj_ref,         # (E, E) compute dtype, (1, E) f32
    ln2w_ref, ln2b_ref,           # (1, E)   f32
    w1_ref, b1_ref,               # (E, 4E) compute dtype, (1, 4E) f32
    w2_ref, b2_ref,               # (4E, E) compute dtype, (1, E) f32
    lmw_ref, lmb_ref,             # (E, Vp) compute dtype, (1, Vp) f32
    logits_ref,                   # (T, Vp)  lane-dense output block (f32)
    x_sc,                         # VMEM (T, E) f32 — residual-stream carrier
    *, num_heads: int,
):
    l = pl.program_id(1)
    n_layers = pl.num_programs(1)
    T, E = x_sc.shape
    H = num_heads
    hd = E // H
    cdt = wqkv_ref.dtype                 # matmul operand dtype (f32 or bf16)
    scale = jnp.float32(E ** -0.5)       # PyTorch code scales by C = num_embed.

    @pl.when(l == 0)
    def _init():
        x_sc[...] = x_ref[...]

    x = x_sc[...]                        # (T, E) f32

    # ---------------- self-attention on ln1(x) ----------------
    xn = _layernorm(x, ln1w_ref[...], ln1b_ref[...])                 # f32
    # Fused QKV projection: one lane-dense, full-depth MXU matmul.
    qkv = jnp.dot(xn.astype(cdt), wqkv_ref[...],
                  preferred_element_type=jnp.float32)                # (T, 3E) f32

    # Additive causal mask (finite sentinel -> NaN-safe); trivially cheap at
    # this T; see TODO(synk) above for flash-style tiling at long T.
    row = lax.broadcasted_iota(jnp.int32, (T, T), 0)
    col = lax.broadcasted_iota(jnp.int32, (T, T), 1)
    mask_bias = jnp.where(col <= row, jnp.float32(0.0), jnp.float32(-1e30))

    # Per-head score/softmax/PV (intrinsically per-head work; QKV and the
    # output projection are already full-width matmuls above/below).
    head_outs = []
    for h in range(H):
        qh = qkv[:, h * hd:(h + 1) * hd]                             # (T, hd)
        kh = qkv[:, E + h * hd:E + (h + 1) * hd]
        vh = qkv[:, 2 * E + h * hd:2 * E + (h + 1) * hd]
        s = jnp.einsum('td,sd->ts', qh.astype(cdt), kh.astype(cdt),
                       preferred_element_type=jnp.float32) * scale   # (T, T)
        s = s + mask_bias
        s = s - jnp.max(s, axis=-1, keepdims=True)
        p = jnp.exp(s)
        p = p * pl.reciprocal(jnp.sum(p, axis=-1, keepdims=True), approx=False)
        head_outs.append(jnp.dot(p.astype(cdt), vh.astype(cdt),
                                 preferred_element_type=jnp.float32))  # (T, hd)

    # Head merge = one small lane concat; projection = one full-depth matmul.
    o = jnp.concatenate(head_outs, axis=-1)                           # (T, E)
    att = jnp.dot(o.astype(cdt), wproj_ref[...],
                  preferred_element_type=jnp.float32) + bproj_ref[...]
    x = x + att

    # ---------------- feed-forward on ln2(x) ----------------
    xn2 = _layernorm(x, ln2w_ref[...], ln2b_ref[...])
    h1 = jnp.dot(xn2.astype(cdt), w1_ref[...],
                 preferred_element_type=jnp.float32) + b1_ref[...]
    h1 = jnp.maximum(h1, 0.0)
    x = x + jnp.dot(h1.astype(cdt), w2_ref[...],
                    preferred_element_type=jnp.float32) + b2_ref[...]

    x_sc[...] = x

    # lm_head only at the last layer step.
    # NOTE: the PyTorch forward never applies self.ln_f, so neither do we.
    @pl.when(l == n_layers - 1)
    def _lm_head():
        logits_ref[...] = (
            jnp.dot(x.astype(cdt), lmw_ref[...],
                    preferred_element_type=jnp.float32) + lmb_ref[...]
        )


# ----------------------------------------------------------------------------
# One-time parameter repacking (called at model setup, NOT per forward call)
# ----------------------------------------------------------------------------
def prepare_kernel_params(params, *, param_dtype=jnp.float32):
    """Stack per-layer weights, fuse q|k|v, pad vocab, cast matmul weights."""
    blocks = params["blocks"]
    V = params["lm_w"].shape[1]
    Vp = ((V + LANE - 1) // LANE) * LANE
    wd = param_dtype

    def stack(name, dtype=jnp.float32):
        return jnp.stack([b[name] for b in blocks]).astype(dtype)

    return {
        "tok_table": params["tok_table"],                              # (V, E) f32
        "pos_table": params["pos_table"],                              # (S, E) f32
        "ln1_w": stack("ln1_w"), "ln1_b": stack("ln1_b"),              # (L, 1, E)
        "wqkv": jnp.stack(
            [jnp.concatenate([b["wq"], b["wk"], b["wv"]], axis=1)
             for b in blocks]).astype(wd),                             # (L, E, 3E)
        "wproj": stack("wproj", wd),                                   # (L, E, E)
        "bproj": stack("bproj"),                                       # (L, 1, E)
        "ln2_w": stack("ln2_w"), "ln2_b": stack("ln2_b"),              # (L, 1, E)
        "w1": stack("w1", wd), "b1": stack("b1"),                      # (L, E, 4E)
        "w2": stack("w2", wd), "b2": stack("b2"),                      # (L, 4E, E)
        "lm_w": jnp.pad(params["lm_w"], ((0, 0), (0, Vp - V))).astype(wd),  # (E, Vp)
        "lm_b": jnp.pad(params["lm_b"], ((0, 0), (0, Vp - V))),        # (1, Vp) f32
    }


_WEIGHT_NAMES = ("ln1_w", "ln1_b", "wqkv", "wproj", "bproj",
                 "ln2_w", "ln2_b", "w1", "b1", "w2", "b2")


def _nbytes(a):
    return a.size * a.dtype.itemsize


def _vmem_limit_bytes(kp, T, Vp):
    E = kp["tok_table"].shape[1]
    L = kp["wqkv"].shape[0]
    per_layer = sum(_nbytes(kp[n]) // L for n in _WEIGHT_NAMES)       # one layer's blocks
    resident = _nbytes(kp["lm_w"]) + _nbytes(kp["lm_b"])              # constant-index inputs
    blocks = T * E * 4 + T * Vp * 4                                   # x block + logits block
    scratch = T * E * 4
    est = 2 * (per_layer + blocks) + resident + scratch               # 2x = double buffering
    est = int(est * 1.5) + (8 << 20)                                  # headroom
    return max(min(est, 64 << 20), 32 << 20)


def _cost_estimate(kp, B, T, Vp, H):
    E = kp["tok_table"].shape[1]
    L = kp["wqkv"].shape[0]
    hd = E // H
    matmul_flops = 2 * B * T * L * (3 * E * E + E * E + 8 * E * E)    # qkv, proj, w1, w2
    attn_flops = 2 * B * L * H * T * T * hd * 2                       # scores + pv
    lm_flops = 2 * B * T * E * Vp
    weight_bytes = sum(_nbytes(kp[n]) for n in _WEIGHT_NAMES) + \
        _nbytes(kp["lm_w"]) + _nbytes(kp["lm_b"])
    act_bytes = B * T * E * 4 + B * T * Vp * 4
    return pl.CostEstimate(
        flops=int(matmul_flops + attn_flops + lm_flops),
        transcendentals=int(B * L * H * T * T),
        bytes_accessed=int(weight_bytes * B + act_bytes),
    )


# ----------------------------------------------------------------------------
# Forward wrapper: single pallas_call, grid = (batch, layer)
# ----------------------------------------------------------------------------
def transformer_forward(idx, kp, *, num_heads, vocab_size):
    """idx: int32 [B, T]; kp: output of prepare_kernel_params.
    Returns logits [B, T, vocab_size]."""
    B, T = idx.shape
    E = kp["tok_table"].shape[1]
    L = kp["wqkv"].shape[0]
    Vp = kp["lm_w"].shape[1]

    # TODO(synk): the nn.Embedding row-gather stays in plain JAX; a manual DMA
    # gather inside the kernel is not worth it at these sizes.
    tok = jnp.take(kp["tok_table"], idx, axis=0)                      # (B, T, E)
    x = (tok + kp["pos_table"][:T][None]).astype(jnp.float32)         # (B, T, E)

    def layer_spec(arr):
        nd = arr.ndim
        return pl.BlockSpec((None,) + arr.shape[1:],
                            lambda b, l, _nd=nd: (l,) + (0,) * (_nd - 1))

    in_specs = [pl.BlockSpec((None, T, E), lambda b, l: (b, 0, 0))]     # x, per-batch
    in_specs += [layer_spec(kp[n]) for n in _WEIGHT_NAMES]              # streamed per-layer
    in_specs += [pl.BlockSpec(kp["lm_w"].shape, lambda b, l: (0, 0)),   # lm_head resident
                 pl.BlockSpec(kp["lm_b"].shape, lambda b, l: (0, 0))]
    out_spec = pl.BlockSpec((None, T, Vp), lambda b, l: (b, 0, 0))      # lane-dense logits

    grid_spec = pltpu.PrefetchScalarGridSpec(
        num_scalar_prefetch=0,
        grid=(B, L),
        in_specs=in_specs,
        out_specs=out_spec,
        scratch_shapes=[pltpu.VMEM((T, E), jnp.float32)],               # residual carrier
    )

    kernel = functools.partial(fused_block_kernel, num_heads=num_heads)

    logits_pad = pl.pallas_call(
        kernel,
        out_shape=jax.ShapeDtypeStruct((B, T, Vp), jnp.float32),
        grid_spec=grid_spec,
        compiler_params=pltpu.CompilerParams(
            dimension_semantics=("parallel", "arbitrary"),   # batch across cores, layers serial
            vmem_limit_bytes=_vmem_limit_bytes(kp, T, Vp),
        ),
        cost_estimate=_cost_estimate(kp, B, T, Vp, num_heads),
    )(x, *[kp[n] for n in _WEIGHT_NAMES], kp["lm_w"], kp["lm_b"])

    return logits_pad[:, :, :vocab_size]


# ----------------------------------------------------------------------------
# Pure-JAX reference (correctness check) — mirrors the PyTorch forward
# ----------------------------------------------------------------------------
def reference_forward(idx, params, *, num_heads):
    B, T = idx.shape
    x = jnp.take(params["tok_table"], idx, axis=0) + params["pos_table"][:T][None]
    E = x.shape[-1]
    hd = E // num_heads
    for p in params["blocks"]:
        xn = _layernorm(x, p["ln1_w"][0], p["ln1_b"][0])
        q = xn @ p["wq"]
        k = xn @ p["wk"]
        v = xn @ p["wv"]
        mask = jnp.tril(jnp.ones((T, T), bool))
        outs = []
        for h in range(num_heads):
            sl = slice(h * hd, (h + 1) * hd)
            wei = (q[..., sl] @ jnp.swapaxes(k[..., sl], -1, -2)) * (E ** -0.5)
            wei = jnp.where(mask, wei, -jnp.inf)
            wei = jax.nn.softmax(wei, axis=-1)
            outs.append(wei @ v[..., sl])
        att = jnp.concatenate(outs, axis=-1) @ p["wproj"] + p["bproj"][0]
        x = x + att
        xn2 = _layernorm(x, p["ln2_w"][0], p["ln2_b"][0])
        ff = jnp.maximum(xn2 @ p["w1"] + p["b1"][0], 0.0) @ p["w2"] + p["b2"][0]
        x = x + ff
    return x @ params["lm_w"] + params["lm_b"][0]


# ----------------------------------------------------------------------------
# Deterministic parameter init (logical / PyTorch-like layout: W is [in, out])
# ----------------------------------------------------------------------------
def init_params(key, *, vocab_size, num_embed, block_size, num_layers):
    def nrm(k, shape, scale=0.02):
        return (scale * jax.random.normal(k, shape)).astype(jnp.float32)

    keys = iter(jax.random.split(key, 8 + num_layers * 16))
    E = num_embed
    params = {
        "tok_table": nrm(next(keys), (vocab_size, E)),
        "pos_table": nrm(next(keys), (block_size, E)),
        "lm_w": nrm(next(keys), (E, vocab_size)),
        "lm_b": jnp.zeros((1, vocab_size), jnp.float32),
        "blocks": [],
    }
    for _ in range(num_layers):
        params["blocks"].append({
            "ln1_w": jnp.ones((1, E), jnp.float32),
            "ln1_b": jnp.zeros((1, E), jnp.float32),
            "wq": nrm(next(keys), (E, E)),
            "wk": nrm(next(keys), (E, E)),
            "wv": nrm(next(keys), (E, E)),
            "wproj": nrm(next(keys), (E, E)),
            "bproj": jnp.zeros((1, E), jnp.float32),
            "ln2_w": jnp.ones((1, E), jnp.float32),
            "ln2_b": jnp.zeros((1, E), jnp.float32),
            "w1": nrm(next(keys), (E, 4 * E)),
            "b1": jnp.zeros((1, 4 * E), jnp.float32),
            "w2": nrm(next(keys), (4 * E, E)),
            "b2": jnp.zeros((1, E), jnp.float32),
        })
    return params


# ----------------------------------------------------------------------------
if __name__ == "__main__":
    VOCAB = 16
    NUM_EMBED = 32
    BLOCK_SIZE = 8
    NUM_HEADS = 4
    NUM_LAYERS = 2
    B, T = 2, 8

    key = jax.random.PRNGKey(0)
    k_par, k_idx = jax.random.split(key)
    params = init_params(
        k_par,
        vocab_size=VOCAB,
        num_embed=NUM_EMBED,
        block_size=BLOCK_SIZE,
        num_layers=NUM_LAYERS,
    )
    idx = jax.random.randint(k_idx, (B, T), 0, VOCAB, dtype=jnp.int32)

    ref = reference_forward(idx, params, num_heads=NUM_HEADS)

    fwd = jax.jit(functools.partial(
        transformer_forward, num_heads=NUM_HEADS, vocab_size=VOCAB))

    # 1) f32 matmul operands: exact-parity check against the reference.
    kp_f32 = prepare_kernel_params(params, param_dtype=jnp.float32)
    logits_f32 = fwd(idx, kp_f32)
    jax.block_until_ready(logits_f32)
    assert logits_f32.shape == (B, T, VOCAB)
    assert jnp.allclose(logits_f32, ref, atol=5e-4, rtol=5e-4), "f32 mismatch vs reference"

    # 2) bf16 matmul operands (MXU-native on v6e/v7x, f32 accumulation &
    #    f32 elementwise math): looser numerical check.
    kp_bf16 = prepare_kernel_params(params, param_dtype=jnp.bfloat16)
    logits_bf16 = fwd(idx, kp_bf16)
    jax.block_until_ready(logits_bf16)
    assert jnp.allclose(logits_bf16, ref, atol=1e-2, rtol=1e-1), "bf16 mismatch vs reference"

    print("KERNEL_OK")
</pallas_src>

<mosaic_0001>
module attributes {stable_mosaic.version = 11 : i64} {
  func.func @fused_block_kernel(%arg0: i32, %arg1: i32, %arg2: memref<1x8x32xf32, #tpu.memory_space<vmem>>, %arg3: memref<1x1x32xf32, #tpu.memory_space<vmem>>, %arg4: memref<1x1x32xf32, #tpu.memory_space<vmem>>, %arg5: memref<1x32x96xf32, #tpu.memory_space<vmem>>, %arg6: memref<1x32x32xf32, #tpu.memory_space<vmem>>, %arg7: memref<1x1x32xf32, #tpu.memory_space<vmem>>, %arg8: memref<1x1x32xf32, #tpu.memory_space<vmem>>, %arg9: memref<1x1x32xf32, #tpu.memory_space<vmem>>, %arg10: memref<1x32x128xf32, #tpu.memory_space<vmem>>, %arg11: memref<1x1x128xf32, #tpu.memory_space<vmem>>, %arg12: memref<1x128x32xf32, #tpu.memory_space<vmem>>, %arg13: memref<1x1x32xf32, #tpu.memory_space<vmem>>, %arg14: memref<32x128xf32, #tpu.memory_space<vmem>>, %arg15: memref<1x128xf32, #tpu.memory_space<vmem>>, %arg16: memref<1x8x128xf32, #tpu.memory_space<vmem>>, %arg17: memref<8x32xf32, #tpu.memory_space<vmem>>) attributes {dimension_semantics = [#tpu.dimension_semantics<parallel>, #tpu.dimension_semantics<arbitrary>], iteration_bounds = array<i64: 2, 2>, scalar_prefetch = 0 : i64, scratch_operands = 1 : i64, tpu.core_type = #tpu.core_type<tc>, window_params = [{transform_indices = @transform_0, window_bounds = array<i64: 1, 8, 32>}, {transform_indices = @transform_1, window_bounds = array<i64: 1, 1, 32>}, {transform_indices = @transform_2, window_bounds = array<i64: 1, 1, 32>}, {transform_indices = @transform_3, window_bounds = array<i64: 1, 32, 96>}, {transform_indices = @transform_4, window_bounds = array<i64: 1, 32, 32>}, {transform_indices = @transform_5, window_bounds = array<i64: 1, 1, 32>}, {transform_indices = @transform_6, window_bounds = array<i64: 1, 1, 32>}, {transform_indices = @transform_7, window_bounds = array<i64: 1, 1, 32>}, {transform_indices = @transform_8, window_bounds = array<i64: 1, 32, 128>}, {transform_indices = @transform_9, window_bounds = array<i64: 1, 1, 128>}, {transform_indices = @transform_10, window_bounds = array<i64: 1, 128, 32>}, {transform_indices = @transform_11, window_bounds = array<i64: 1, 1, 32>}, {pipeline_mode = #tpu.pipeline_mode<synchronous>, transform_indices = @transform_12, window_bounds = array<i64: 32, 128>}, {pipeline_mode = #tpu.pipeline_mode<synchronous>, transform_indices = @transform_13, window_bounds = array<i64: 1, 128>}, {transform_indices = @transform_14, window_bounds = array<i64: 1, 8, 128>}]} {
    %c0_i32 = arith.constant 0 : i32
    %0 = arith.cmpi eq, %arg1, %c0_i32 : i32
    %1 = arith.extui %0 : i1 to i32
    %c0_i32_0 = arith.constant 0 : i32
    %2 = arith.cmpi ne, %1, %c0_i32_0 : i32
    scf.if %2 {
      %c0_74 = arith.constant 0 : index
      %c0_75 = arith.constant 0 : index
      %c0_76 = arith.constant 0 : index
      %171 = vector.load %arg2[%c0_74, %c0_75, %c0_76] : memref<1x8x32xf32, #tpu.memory_space<vmem>>, vector<1x8x32xf32>
      %172 = vector.shape_cast %171 : vector<1x8x32xf32> to vector<8x32xf32>
      %c0_77 = arith.constant 0 : index
      %c0_78 = arith.constant 0 : index
      %173 = vector.load %arg17[%c0_77, %c0_78] : memref<8x32xf32, #tpu.memory_space<vmem>>, vector<8x32xf32>
      tpu.vector_store %arg17[%c0_77, %c0_78], %172 {strides = array<i32>} : memref<8x32xf32, #tpu.memory_space<vmem>>, vector<8x32xf32>,
    } else {
    }
    %c0 = arith.constant 0 : index
    %c0_1 = arith.constant 0 : index
    %3 = vector.load %arg17[%c0, %c0_1] : memref<8x32xf32, #tpu.memory_space<vmem>>, vector<8x32xf32>
    %c0_2 = arith.constant 0 : index
    %c0_3 = arith.constant 0 : index
    %c0_4 = arith.constant 0 : index
    %4 = vector.load %arg3[%c0_2, %c0_3, %c0_4] : memref<1x1x32xf32, #tpu.memory_space<vmem>>, vector<1x1x32xf32>
    %5 = vector.shape_cast %4 : vector<1x1x32xf32> to vector<1x32xf32>
    %c0_5 = arith.constant 0 : index
    %c0_6 = arith.constant 0 : index
    %c0_7 = arith.constant 0 : index
    %6 = vector.load %arg4[%c0_5, %c0_6, %c0_7] : memref<1x1x32xf32, #tpu.memory_space<vmem>>, vector<1x1x32xf32>
    %7 = vector.shape_cast %6 : vector<1x1x32xf32> to vector<1x32xf32>
    %cst = arith.constant dense<0.000000e+00> : vector<8xf32>
    %8 = vector.multi_reduction <add>, %3, %cst [1] : vector<8x32xf32> to vector<8xf32>
    %9 = vector.shape_cast %8 : vector<8xf32> to vector<8x1xf32>
    %cst_8 = arith.constant 3.200000e+01 : f32
    %10 = vector.broadcast %cst_8 : f32 to vector<8x1xf32>
    %11 = arith.divf %9, %10 : vector<8x1xf32>
    %12 = vector.broadcast %11 : vector<8x1xf32> to vector<8x32xf32>
    %13 = arith.subf %3, %12 : vector<8x32xf32>
    %14 = vector.broadcast %11 : vector<8x1xf32> to vector<8x32xf32>
    %15 = arith.subf %3, %14 : vector<8x32xf32>
    %16 = arith.mulf %13, %15 : vector<8x32xf32>
    %cst_9 = arith.constant dense<0.000000e+00> : vector<8xf32>
    %17 = vector.multi_reduction <add>, %16, %cst_9 [1] : vector<8x32xf32> to vector<8xf32>
    %18 = vector.shape_cast %17 : vector<8xf32> to vector<8x1xf32>
    %cst_10 = arith.constant 3.200000e+01 : f32
    %19 = vector.broadcast %cst_10 : f32 to vector<8x1xf32>
    %20 = arith.divf %18, %19 : vector<8x1xf32>
    %21 = vector.broadcast %11 : vector<8x1xf32> to vector<8x32xf32>
    %22 = arith.subf %3, %21 : vector<8x32xf32>
    %cst_11 = arith.constant 9.99999974E-6 : f32
    %23 = vector.broadcast %cst_11 : f32 to vector<8x1xf32>
    %24 = arith.addf %20, %23 : vector<8x1xf32>
    %25 = math.rsqrt %24 : vector<8x1xf32>
    %26 = vector.broadcast %25 : vector<8x1xf32> to vector<8x32xf32>
    %27 = arith.mulf %22, %26 : vector<8x32xf32>
    %28 = vector.broadcast %5 : vector<1x32xf32> to vector<8x32xf32>
    %29 = arith.mulf %27, %28 : vector<8x32xf32>
    %30 = vector.broadcast %7 : vector<1x32xf32> to vector<8x32xf32>
    %31 = arith.addf %29, %30 : vector<8x32xf32>
    %c0_12 = arith.constant 0 : index
    %c0_13 = arith.constant 0 : index
    %c0_14 = arith.constant 0 : index
    %32 = vector.load %arg5[%c0_12, %c0_13, %c0_14] : memref<1x32x96xf32, #tpu.memory_space<vmem>>, vector<1x32x96xf32>
    %33 = vector.shape_cast %32 : vector<1x32x96xf32> to vector<32x96xf32>
    %cst_15 = arith.constant dense<0.000000e+00> : vector<8x96xf32>
    %34 = tpu.matmul %31, %33, %cst_15 {dimension_numbers = #tpu.dot_dimension_numbers<[1], [0], [0], [1], [0, 0, 1, 1], [], []>} : vector<8x32xf32>, vector<32x96xf32>, vector<8x96xf32> -> vector<8x96xf32>
    %35 = tpu.iota {dimensions = array<i32: 0>} : vector<8x8xi32>
    %36 = tpu.iota {dimensions = array<i32: 1>} : vector<8x8xi32>
    %37 = arith.cmpi sle, %36, %35 : vector<8x8xi32>
    %cst_16 = arith.constant 0.000000e+00 : f32
    %cst_17 = arith.constant -1.000000e+30 : f32
    %38 = vector.broadcast %cst_16 : f32 to vector<8x8xf32>
    %39 = vector.broadcast %cst_17 : f32 to vector<8x8xf32>
    %40 = arith.select %37, %38, %39 : vector<8x8xi1>, vector<8x8xf32>
    %41 = vector.extract_strided_slice %34 {offsets = [0, 0], sizes = [8, 8], strides = [1, 1]} : vector<8x96xf32> to vector<8x8xf32>
    %42 = vector.extract_strided_slice %34 {offsets = [0, 32], sizes = [8, 8], strides = [1, 1]} : vector<8x96xf32> to vector<8x8xf32>
    %43 = vector.extract_strided_slice %34 {offsets = [0, 64], sizes = [8, 8], strides = [1, 1]} : vector<8x96xf32> to vector<8x8xf32>
    "tpu.trace_start"() <{level = 10 : i32, message = "td,sd->ts"}> : () -> ()
    %cst_18 = arith.constant dense<0.000000e+00> : vector<8x8xf32>
    %44 = tpu.matmul %41, %42, %cst_18 {dimension_numbers = #tpu.dot_dimension_numbers<[1], [1], [0], [0], [0, 0, 1, 0], [], []>} : vector<8x8xf32>, vector<8x8xf32>, vector<8x8xf32> -> vector<8x8xf32>
    "tpu.trace_stop"() : () -> ()
    %cst_19 = arith.constant 0.176776692 : f32
    %45 = vector.broadcast %cst_19 : f32 to vector<8x8xf32>
    %46 = arith.mulf %44, %45 : vector<8x8xf32>
    %47 = arith.addf %46, %40 : vector<8x8xf32>
    %cst_20 = arith.constant dense<0xFF800000> : vector<8xf32>
    %48 = vector.multi_reduction <maximumf>, %47, %cst_20 [1] : vector<8x8xf32> to vector<8xf32>
    %49 = vector.shape_cast %48 : vector<8xf32> to vector<8x1xf32>
    %50 = vector.broadcast %49 : vector<8x1xf32> to vector<8x8xf32>
    %51 = arith.subf %47, %50 : vector<8x8xf32>
    %52 = math.exp %51 : vector<8x8xf32>
    %cst_21 = arith.constant dense<0.000000e+00> : vector<8xf32>
    %53 = vector.multi_reduction <add>, %52, %cst_21 [1] : vector<8x8xf32> to vector<8xf32>
    %54 = vector.shape_cast %53 : vector<8xf32> to vector<8x1xf32>
    %55 = tpu.reciprocal %54 : vector<8x1xf32> -> vector<8x1xf32>
    %56 = vector.broadcast %55 : vector<8x1xf32> to vector<8x8xf32>
    %57 = arith.mulf %52, %56 : vector<8x8xf32>
    %cst_22 = arith.constant dense<0.000000e+00> : vector<8x8xf32>
    %58 = tpu.matmul %57, %43, %cst_22 {dimension_numbers = #tpu.dot_dimension_numbers<[1], [0], [0], [1], [0, 0, 1, 1], [], []>} : vector<8x8xf32>, vector<8x8xf32>, vector<8x8xf32> -> vector<8x8xf32>
    %59 = vector.extract_strided_slice %34 {offsets = [0, 8], sizes = [8, 8], strides = [1, 1]} : vector<8x96xf32> to vector<8x8xf32>
    %60 = vector.extract_strided_slice %34 {offsets = [0, 40], sizes = [8, 8], strides = [1, 1]} : vector<8x96xf32> to vector<8x8xf32>
    %61 = vector.extract_strided_slice %34 {offsets = [0, 72], sizes = [8, 8], strides = [1, 1]} : vector<8x96xf32> to vector<8x8xf32>
    "tpu.trace_start"() <{level = 10 : i32, message = "td,sd->ts"}> : () -> ()
    %cst_23 = arith.constant dense<0.000000e+00> : vector<8x8xf32>
    %62 = tpu.matmul %59, %60, %cst_23 {dimension_numbers = #tpu.dot_dimension_numbers<[1], [1], [0], [0], [0, 0, 1, 0], [], []>} : vector<8x8xf32>, vector<8x8xf32>, vector<8x8xf32> -> vector<8x8xf32>
    "tpu.trace_stop"() : () -> ()
    %cst_24 = arith.constant 0.176776692 : f32
    %63 = vector.broadcast %cst_24 : f32 to vector<8x8xf32>
    %64 = arith.mulf %62, %63 : vector<8x8xf32>
    %65 = arith.addf %64, %40 : vector<8x8xf32>
    %cst_25 = arith.constant dense<0xFF800000> : vector<8xf32>
    %66 = vector.multi_reduction <maximumf>, %65, %cst_25 [1] : vector<8x8xf32> to vector<8xf32>
    %67 = vector.shape_cast %66 : vector<8xf32> to vector<8x1xf32>
    %68 = vector.broadcast %67 : vector<8x1xf32> to vector<8x8xf32>
    %69 = arith.subf %65, %68 : vector<8x8xf32>
    %70 = math.exp %69 : vector<8x8xf32>
    %cst_26 = arith.constant dense<0.000000e+00> : vector<8xf32>
    %71 = vector.multi_reduction <add>, %70, %cst_26 [1] : vector<8x8xf32> to vector<8xf32>
    %72 = vector.shape_cast %71 : vector<8xf32> to vector<8x1xf32>
    %73 = tpu.reciprocal %72 : vector<8x1xf32> -> vector<8x1xf32>
    %74 = vector.broadcast %73 : vector<8x1xf32> to vector<8x8xf32>
    %75 = arith.mulf %70, %74 : vector<8x8xf32>
    %cst_27 = arith.constant dense<0.000000e+00> : vector<8x8xf32>
    %76 = tpu.matmul %75, %61, %cst_27 {dimension_numbers = #tpu.dot_dimension_numbers<[1], [0], [0], [1], [0, 0, 1, 1], [], []>} : vector<8x8xf32>, vector<8x8xf32>, vector<8x8xf32> -> vector<8x8xf32>
    %77 = vector.extract_strided_slice %34 {offsets = [0, 16], sizes = [8, 8], strides = [1, 1]} : vector<8x96xf32> to vector<8x8xf32>
    %78 = vector.extract_strided_slice %34 {offsets = [0, 48], sizes = [8, 8], strides = [1, 1]} : vector<8x96xf32> to vector<8x8xf32>
    %79 = vector.extract_strided_slice %34 {offsets = [0, 80], sizes = [8, 8], strides = [1, 1]} : vector<8x96xf32> to vector<8x8xf32>
    "tpu.trace_start"() <{level = 10 : i32, message = "td,sd->ts"}> : () -> ()
    %cst_28 = arith.constant dense<0.000000e+00> : vector<8x8xf32>
    %80 = tpu.matmul %77, %78, %cst_28 {dimension_numbers = #tpu.dot_dimension_numbers<[1], [1], [0], [0], [0, 0, 1, 0], [], []>} : vector<8x8xf32>, vector<8x8xf32>, vector<8x8xf32> -> vector<8x8xf32>
    "tpu.trace_stop"() : () -> ()
    %cst_29 = arith.constant 0.176776692 : f32
    %81 = vector.broadcast %cst_29 : f32 to vector<8x8xf32>
    %82 = arith.mulf %80, %81 : vector<8x8xf32>
    %83 = arith.addf %82, %40 : vector<8x8xf32>
    %cst_30 = arith.constant dense<0xFF800000> : vector<8xf32>
    %84 = vector.multi_reduction <maximumf>, %83, %cst_30 [1] : vector<8x8xf32> to vector<8xf32>
    %85 = vector.shape_cast %84 : vector<8xf32> to vector<8x1xf32>
    %86 = vector.broadcast %85 : vector<8x1xf32> to vector<8x8xf32>
    %87 = arith.subf %83, %86 : vector<8x8xf32>
    %88 = math.exp %87 : vector<8x8xf32>
    %cst_31 = arith.constant dense<0.000000e+00> : vector<8xf32>
    %89 = vector.multi_reduction <add>, %88, %cst_31 [1] : vector<8x8xf32> to vector<8xf32>
    %90 = vector.shape_cast %89 : vector<8xf32> to vector<8x1xf32>
    %91 = tpu.reciprocal %90 : vector<8x1xf32> -> vector<8x1xf32>
    %92 = vector.broadcast %91 : vector<8x1xf32> to vector<8x8xf32>
    %93 = arith.mulf %88, %92 : vector<8x8xf32>
    %cst_32 = arith.constant dense<0.000000e+00> : vector<8x8xf32>
    %94 = tpu.matmul %93, %79, %cst_32 {dimension_numbers = #tpu.dot_dimension_numbers<[1], [0], [0], [1], [0, 0, 1, 1], [], []>} : vector<8x8xf32>, vector<8x8xf32>, vector<8x8xf32> -> vector<8x8xf32>
    %95 = vector.extract_strided_slice %34 {offsets = [0, 24], sizes = [8, 8], strides = [1, 1]} : vector<8x96xf32> to vector<8x8xf32>
    %96 = vector.extract_strided_slice %34 {offsets = [0, 56], sizes = [8, 8], strides = [1, 1]} : vector<8x96xf32> to vector<8x8xf32>
    %97 = vector.extract_strided_slice %34 {offsets = [0, 88], sizes = [8, 8], strides = [1, 1]} : vector<8x96xf32> to vector<8x8xf32>
    "tpu.trace_start"() <{level = 10 : i32, message = "td,sd->ts"}> : () -> ()
    %cst_33 = arith.constant dense<0.000000e+00> : vector<8x8xf32>
    %98 = tpu.matmul %95, %96, %cst_33 {dimension_numbers = #tpu.dot_dimension_numbers<[1], [1], [0], [0], [0, 0, 1, 0], [], []>} : vector<8x8xf32>, vector<8x8xf32>, vector<8x8xf32> -> vector<8x8xf32>
    "tpu.trace_stop"() : () -> ()
    %cst_34 = arith.constant 0.176776692 : f32
    %99 = vector.broadcast %cst_34 : f32 to vector<8x8xf32>
    %100 = arith.mulf %98, %99 : vector<8x8xf32>
    %101 = arith.addf %100, %40 : vector<8x8xf32>
    %cst_35 = arith.constant dense<0xFF800000> : vector<8xf32>
    %102 = vector.multi_reduction <maximumf>, %101, %cst_35 [1] : vector<8x8xf32> to vector<8xf32>
    %103 = vector.shape_cast %102 : vector<8xf32> to vector<8x1xf32>
    %104 = vector.broadcast %103 : vector<8x1xf32> to vector<8x8xf32>
    %105 = arith.subf %101, %104 : vector<8x8xf32>
    %106 = math.exp %105 : vector<8x8xf32>
    %cst_36 = arith.constant dense<0.000000e+00> : vector<8xf32>
    %107 = vector.multi_reduction <add>, %106, %cst_36 [1] : vector<8x8xf32> to vector<8xf32>
    %108 = vector.shape_cast %107 : vector<8xf32> to vector<8x1xf32>
    %109 = tpu.reciprocal %108 : vector<8x1xf32> -> vector<8x1xf32>
    %110 = vector.broadcast %109 : vector<8x1xf32> to vector<8x8xf32>
    %111 = arith.mulf %106, %110 : vector<8x8xf32>
    %cst_37 = arith.constant dense<0.000000e+00> : vector<8x8xf32>
    %112 = tpu.matmul %111, %97, %cst_37 {dimension_numbers = #tpu.dot_dimension_numbers<[1], [0], [0], [1], [0, 0, 1, 1], [], []>} : vector<8x8xf32>, vector<8x8xf32>, vector<8x8xf32> -> vector<8x8xf32>
    %113 = tpu.concatenate %58, %76, %94, %112 in 1 : vector<8x8xf32>, vector<8x8xf32>, vector<8x8xf32>, vector<8x8xf32> -> vector<8x32xf32>
    %c0_38 = arith.constant 0 : index
    %c0_39 = arith.constant 0 : index
    %c0_40 = arith.constant 0 : index
    %114 = vector.load %arg6[%c0_38, %c0_39, %c0_40] : memref<1x32x32xf32, #tpu.memory_space<vmem>>, vector<1x32x32xf32>
    %115 = vector.shape_cast %114 : vector<1x32x32xf32> to vector<32x32xf32>
    %cst_41 = arith.constant dense<0.000000e+00> : vector<8x32xf32>
    %116 = tpu.matmul %113, %115, %cst_41 {dimension_numbers = #tpu.dot_dimension_numbers<[1], [0], [0], [1], [0, 0, 1, 1], [], []>} : vector<8x32xf32>, vector<32x32xf32>, vector<8x32xf32> -> vector<8x32xf32>
    %c0_42 = arith.constant 0 : index
    %c0_43 = arith.constant 0 : index
    %c0_44 = arith.constant 0 : index
    %117 = vector.load %arg7[%c0_42, %c0_43, %c0_44] : memref<1x1x32xf32, #tpu.memory_space<vmem>>, vector<1x1x32xf32>
    %118 = vector.shape_cast %117 : vector<1x1x32xf32> to vector<1x32xf32>
    %119 = vector.broadcast %118 : vector<1x32xf32> to vector<8x32xf32>
    %120 = arith.addf %116, %119 : vector<8x32xf32>
    %121 = arith.addf %3, %120 : vector<8x32xf32>
    %c0_45 = arith.constant 0 : index
    %c0_46 = arith.constant 0 : index
    %c0_47 = arith.constant 0 : index
    %122 = vector.load %arg8[%c0_45, %c0_46, %c0_47] : memref<1x1x32xf32, #tpu.memory_space<vmem>>, vector<1x1x32xf32>
    %123 = vector.shape_cast %122 : vector<1x1x32xf32> to vector<1x32xf32>
    %c0_48 = arith.constant 0 : index
    %c0_49 = arith.constant 0 : index
    %c0_50 = arith.constant 0 : index
    %124 = vector.load %arg9[%c0_48, %c0_49, %c0_50] : memref<1x1x32xf32, #tpu.memory_space<vmem>>, vector<1x1x32xf32>
    %125 = vector.shape_cast %124 : vector<1x1x32xf32> to vector<1x32xf32>
    %cst_51 = arith.constant dense<0.000000e+00> : vector<8xf32>
    %126 = vector.multi_reduction <add>, %121, %cst_51 [1] : vector<8x32xf32> to vector<8xf32>
    %127 = vector.shape_cast %126 : vector<8xf32> to vector<8x1xf32>
    %cst_52 = arith.constant 3.200000e+01 : f32
    %128 = vector.broadcast %cst_52 : f32 to vector<8x1xf32>
    %129 = arith.divf %127, %128 : vector<8x1xf32>
    %130 = vector.broadcast %129 : vector<8x1xf32> to vector<8x32xf32>
    %131 = arith.subf %121, %130 : vector<8x32xf32>
    %132 = vector.broadcast %129 : vector<8x1xf32> to vector<8x32xf32>
    %133 = arith.subf %121, %132 : vector<8x32xf32>
    %134 = arith.mulf %131, %133 : vector<8x32xf32>
    %cst_53 = arith.constant dense<0.000000e+00> : vector<8xf32>
    %135 = vector.multi_reduction <add>, %134, %cst_53 [1] : vector<8x32xf32> to vector<8xf32>
    %136 = vector.shape_cast %135 : vector<8xf32> to vector<8x1xf32>
    %cst_54 = arith.constant 3.200000e+01 : f32
    %137 = vector.broadcast %cst_54 : f32 to vector<8x1xf32>
    %138 = arith.divf %136, %137 : vector<8x1xf32>
    %139 = vector.broadcast %129 : vector<8x1xf32> to vector<8x32xf32>
    %140 = arith.subf %121, %139 : vector<8x32xf32>
    %cst_55 = arith.constant 9.99999974E-6 : f32
    %141 = vector.broadcast %cst_55 : f32 to vector<8x1xf32>
    %142 = arith.addf %138, %141 : vector<8x1xf32>
    %143 = math.rsqrt %142 : vector<8x1xf32>
    %144 = vector.broadcast %143 : vector<8x1xf32> to vector<8x32xf32>
    %145 = arith.mulf %140, %144 : vector<8x32xf32>
    %146 = vector.broadcast %123 : vector<1x32xf32> to vector<8x32xf32>
    %147 = arith.mulf %145, %146 : vector<8x32xf32>
    %148 = vector.broadcast %125 : vector<1x32xf32> to vector<8x32xf32>
    %149 = arith.addf %147, %148 : vector<8x32xf32>
    %c0_56 = arith.constant 0 : index
    %c0_57 = arith.constant 0 : index
    %c0_58 = arith.constant 0 : index
    %150 = vector.load %arg10[%c0_56, %c0_57, %c0_58] : memref<1x32x128xf32, #tpu.memory_space<vmem>>, vector<1x32x128xf32>
    %151 = vector.shape_cast %150 : vector<1x32x128xf32> to vector<32x128xf32>
    %cst_59 = arith.constant dense<0.000000e+00> : vector<8x128xf32>
    %152 = tpu.matmul %149, %151, %cst_59 {dimension_numbers = #tpu.dot_dimension_numbers<[1], [0], [0], [1], [0, 0, 1, 1], [], []>} : vector<8x32xf32>, vector<32x128xf32>, vector<8x128xf32> -> vector<8x128xf32>
    %c0_60 = arith.constant 0 : index
    %c0_61 = arith.constant 0 : index
    %c0_62 = arith.constant 0 : index
    %153 = vector.load %arg11[%c0_60, %c0_61, %c0_62] : memref<1x1x128xf32, #tpu.memory_space<vmem>>, vector<1x1x128xf32>
    %154 = vector.shape_cast %153 : vector<1x1x128xf32> to vector<1x128xf32>
    %155 = vector.broadcast %154 : vector<1x128xf32> to vector<8x128xf32>
    %156 = arith.addf %152, %155 : vector<8x128xf32>
    %cst_63 = arith.constant 0.000000e+00 : f32
    %157 = vector.broadcast %cst_63 : f32 to vector<8x128xf32>
    %158 = arith.maximumf %156, %157 : vector<8x128xf32>
    %c0_64 = arith.constant 0 : index
    %c0_65 = arith.constant 0 : index
    %c0_66 = arith.constant 0 : index
    %159 = vector.load %arg12[%c0_64, %c0_65, %c0_66] : memref<1x128x32xf32, #tpu.memory_space<vmem>>, vector<1x128x32xf32>
    %160 = vector.shape_cast %159 : vector<1x128x32xf32> to vector<128x32xf32>
    %cst_67 = arith.constant dense<0.000000e+00> : vector<8x32xf32>
    %161 = tpu.matmul %158, %160, %cst_67 {dimension_numbers = #tpu.dot_dimension_numbers<[1], [0], [0], [1], [0, 0, 1, 1], [], []>} : vector<8x128xf32>, vector<128x32xf32>, vector<8x32xf32> -> vector<8x32xf32>
    %162 = arith.addf %121, %161 : vector<8x32xf32>
    %c0_68 = arith.constant 0 : index
    %c0_69 = arith.constant 0 : index
    %c0_70 = arith.constant 0 : index
    %163 = vector.load %arg13[%c0_68, %c0_69, %c0_70] : memref<1x1x32xf32, #tpu.memory_space<vmem>>, vector<1x1x32xf32>
    %164 = vector.shape_cast %163 : vector<1x1x32xf32> to vector<1x32xf32>
    %165 = vector.broadcast %164 : vector<1x32xf32> to vector<8x32xf32>
    %166 = arith.addf %162, %165 : vector<8x32xf32>
    %c0_71 = arith.constant 0 : index
    %c0_72 = arith.constant 0 : index
    %167 = vector.load %arg17[%c0_71, %c0_72] : memref<8x32xf32, #tpu.memory_space<vmem>>, vector<8x32xf32>
    tpu.vector_store %arg17[%c0_71, %c0_72], %166 {strides = array<i32>} : memref<8x32xf32, #tpu.memory_space<vmem>>, vector<8x32xf32>,
    %c1_i32 = arith.constant 1 : i32
    %168 = arith.cmpi eq, %arg1, %c1_i32 : i32
    %169 = arith.extui %168 : i1 to i32
    %c0_i32_73 = arith.constant 0 : i32
    %170 = arith.cmpi ne, %169, %c0_i32_73 : i32
    scf.if %170 {
      %c0_74 = arith.constant 0 : index
      %c0_75 = arith.constant 0 : index
      %171 = vector.load %arg14[%c0_74, %c0_75] : memref<32x128xf32, #tpu.memory_space<vmem>>, vector<32x128xf32>
      %cst_76 = arith.constant dense<0.000000e+00> : vector<8x128xf32>
      %172 = tpu.matmul %166, %171, %cst_76 {dimension_numbers = #tpu.dot_dimension_numbers<[1], [0], [0], [1], [0, 0, 1, 1], [], []>} : vector<8x32xf32>, vector<32x128xf32>, vector<8x128xf32> -> vector<8x128xf32>
      %c0_77 = arith.constant 0 : index
      %c0_78 = arith.constant 0 : index
      %173 = vector.load %arg15[%c0_77, %c0_78] : memref<1x128xf32, #tpu.memory_space<vmem>>, vector<1x128xf32>
      %174 = vector.broadcast %173 : vector<1x128xf32> to vector<8x128xf32>
      %175 = arith.addf %172, %174 : vector<8x128xf32>
      %c0_79 = arith.constant 0 : index
      %c0_80 = arith.constant 0 : index
      %c0_81 = arith.constant 0 : index
      %176 = vector.load %arg16[%c0_79, %c0_80, %c0_81] : memref<1x8x128xf32, #tpu.memory_space<vmem>>, vector<1x8x128xf32>
      %177 = vector.shape_cast %176 : vector<1x8x128xf32> to vector<8x128xf32>
      %178 = vector.shape_cast %175 : vector<8x128xf32> to vector<1x8x128xf32>
      tpu.vector_store %arg16[%c0_79, %c0_80, %c0_81], %178 {strides = array<i32>} : memref<1x8x128xf32, #tpu.memory_space<vmem>>, vector<1x8x128xf32>,
    } else {
    }
    return
  }
  func.func @transform_0(%arg0: i32, %arg1: i32) -> (i32, i32, i32) {
    %c0_i32 = arith.constant 0 : i32
    %c0_i32_0 = arith.constant 0 : i32
    %c0_i32_1 = arith.constant 0 : i32
    return %arg0, %c0_i32, %c0_i32_0 : i32, i32, i32
  }
  func.func @transform_1(%arg0: i32, %arg1: i32) -> (i32, i32, i32) {
    %c0_i32 = arith.constant 0 : i32
    %c0_i32_0 = arith.constant 0 : i32
    %c0_i32_1 = arith.constant 0 : i32
    return %arg1, %c0_i32, %c0_i32_0 : i32, i32, i32
  }
  func.func @transform_2(%arg0: i32, %arg1: i32) -> (i32, i32, i32) {
    %c0_i32 = arith.constant 0 : i32
    %c0_i32_0 = arith.constant 0 : i32
    %c0_i32_1 = arith.constant 0 : i32
    return %arg1, %c0_i32, %c0_i32_0 : i32, i32, i32
  }
  func.func @transform_3(%arg0: i32, %arg1: i32) -> (i32, i32, i32) {
    %c0_i32 = arith.constant 0 : i32
    %c0_i32_0 = arith.constant 0 : i32
    %c0_i32_1 = arith.constant 0 : i32
    return %arg1, %c0_i32, %c0_i32_0 : i32, i32, i32
  }
  func.func @transform_4(%arg0: i32, %arg1: i32) -> (i32, i32, i32) {
    %c0_i32 = arith.constant 0 : i32
    %c0_i32_0 = arith.constant 0 : i32
    %c0_i32_1 = arith.constant 0 : i32
    return %arg1, %c0_i32, %c0_i32_0 : i32, i32, i32
  }
  func.func @transform_5(%arg0: i32, %arg1: i32) -> (i32, i32, i32) {
    %c0_i32 = arith.constant 0 : i32
    %c0_i32_0 = arith.constant 0 : i32
    %c0_i32_1 = arith.constant 0 : i32
    return %arg1, %c0_i32, %c0_i32_0 : i32, i32, i32
  }
  func.func @transform_6(%arg0: i32, %arg1: i32) -> (i32, i32, i32) {
    %c0_i32 = arith.constant 0 : i32
    %c0_i32_0 = arith.constant 0 : i32
    %c0_i32_1 = arith.constant 0 : i32
    return %arg1, %c0_i32, %c0_i32_0 : i32, i32, i32
  }
  func.func @transform_7(%arg0: i32, %arg1: i32) -> (i32, i32, i32) {
    %c0_i32 = arith.constant 0 : i32
    %c0_i32_0 = arith.constant 0 : i32
    %c0_i32_1 = arith.constant 0 : i32
    return %arg1, %c0_i32, %c0_i32_0 : i32, i32, i32
  }
  func.func @transform_8(%arg0: i32, %arg1: i32) -> (i32, i32, i32) {
    %c0_i32 = arith.constant 0 : i32
    %c0_i32_0 = arith.constant 0 : i32
    %c0_i32_1 = arith.constant 0 : i32
    return %arg1, %c0_i32, %c0_i32_0 : i32, i32, i32
  }
  func.func @transform_9(%arg0: i32, %arg1: i32) -> (i32, i32, i32) {
    %c0_i32 = arith.constant 0 : i32
    %c0_i32_0 = arith.constant 0 : i32
    %c0_i32_1 = arith.constant 0 : i32
    return %arg1, %c0_i32, %c0_i32_0 : i32, i32, i32
  }
  func.func @transform_10(%arg0: i32, %arg1: i32) -> (i32, i32, i32) {
    %c0_i32 = arith.constant 0 : i32
    %c0_i32_0 = arith.constant 0 : i32
    %c0_i32_1 = arith.constant 0 : i32
    return %arg1, %c0_i32, %c0_i32_0 : i32, i32, i32
  }
  func.func @transform_11(%arg0: i32, %arg1: i32) -> (i32, i32, i32) {
    %c0_i32 = arith.constant 0 : i32
    %c0_i32_0 = arith.constant 0 : i32
    %c0_i32_1 = arith.constant 0 : i32
    return %arg1, %c0_i32, %c0_i32_0 : i32, i32, i32
  }
  func.func @transform_12(%arg0: i32, %arg1: i32) -> (i32, i32) {
    %c0_i32 = arith.constant 0 : i32
    %c0_i32_0 = arith.constant 0 : i32
    %c0_i32_1 = arith.constant 0 : i32
    return %c0_i32, %c0_i32_0 : i32, i32
  }
  func.func @transform_13(%arg0: i32, %arg1: i32) -> (i32, i32) {
    %c0_i32 = arith.constant 0 : i32
    %c0_i32_0 = arith.constant 0 : i32
    %c0_i32_1 = arith.constant 0 : i32
    return %c0_i32, %c0_i32_0 : i32, i32
  }
  func.func @transform_14(%arg0: i32, %arg1: i32) -> (i32, i32, i32) {
    %c0_i32 = arith.constant 0 : i32
    %c0_i32_0 = arith.constant 0 : i32
    %c0_i32_1 = arith.constant 0 : i32
    return %arg0, %c0_i32, %c0_i32_0 : i32, i32, i32
  }
}

</mosaic_0001>

<bundles_post_ra>
// kernel: transformer_forward.1
= control target key start
LH: loop header
LB: loop body
LE: loop exit
PB: predicated region body
PF: predicated region fallthrough
CT: control target
= control target key end

     0   :  { %s2984_s0 = inlined_call_operand.vmem [shape: f32[2,8,32], index: 0, kind: input, shape index: {}]   ;;  %s2985_s1 = inlined_call_operand.vmem [shape: f32[2,1,32], index: 1, kind: input, shape index: {}]   ;;  %s2986_s2 = inlined_call_operand.vmem [shape: f32[2,1,32], index: 2, kind: input, shape index: {}]   ;;  %s2987_s3 = inlined_call_operand.vmem [shape: f32[2,32,96], index: 3, kind: input, shape index: {}]   ;;  %s2988_s4 = inlined_call_operand.vmem [shape: f32[2,32,32], index: 4, kind: input, shape index: {}]   ;;  %s2989_s5 = inlined_call_operand.vmem [shape: f32[2,1,32], index: 5, kind: input, shape index: {}]   ;;  %s2990_s6 = inlined_call_operand.vmem [shape: f32[2,1,32], index: 6, kind: input, shape index: {}]   ;;  %s2991_s7 = inlined_call_operand.vmem [shape: f32[2,1,32], index: 7, kind: input, shape index: {}]   ;;  %s2992_s8 = inlined_call_operand.vmem [shape: f32[2,32,128], index: 8, kind: input, shape index: {}]   ;;  %s2993_s9 = inlined_call_operand.vmem [shape: f32[2,1,128], index: 9, kind: input, shape index: {}]   ;;  %s2994_s10 = inlined_call_operand.vmem [shape: f32[2,128,32], index: 10, kind: input, shape index: {}]   ;;  %s2995_s11 = inlined_call_operand.vmem [shape: f32[2,1,32], index: 11, kind: input, shape index: {}]   ;;  %s2996_s12 = inlined_call_operand.vmem [shape: f32[32,128], index: 12, kind: input, shape index: {}]   ;;  %s2997_s13 = inlined_call_operand.vmem [shape: f32[1,128], index: 13, kind: input, shape index: {}]   ;;  %s2998_s14 = inlined_call_operand.hbm [shape: f32[2,8,128], index: 14, kind: output, shape index: {}]  }
   0x1   :  { %3015 = sst [smem:[#allocation19_spill]] %s2984_s0 }
   0x2   :  { %3016 = sst [smem:[#allocation20_spill]] %s2987_s3 }
   0x3   :  { %3017 = sst [smem:[#allocation21_spill]] %s2988_s4 }
   0x4   :  { %3018 = sst [smem:[#allocation22_spill]] %s2996_s12 }
   0x5   :  { %3019 = sst [smem:[#allocation23_spill]] %s2997_s13 }
   0x6   :  { %3020 = sst [smem:[#allocation24_spill]] %s2998_s14 }
   0x7   :  { %19 = vsyncpa [#allocation4], 0 }
   0x8   :  { %21 = vsyncpa [#allocation4 + $0x1], 0  ;;  %s2613_s29 = smov 0   ;;  %s2615_s30 = smov 0  }
   0x9   :  { %s2617_s15 = smov 0   ;;  %s2619_s16 = smov 0  }
   0xa   :  { %s2621_s17 = smov 0   ;;  %s2623_s18 = smov 0  }
   0xb   :  { %s2625_s19 = smov 0   ;;  %s2627_s20 = smov 0  }
   0xc LB: > { %3021 = sst [smem:[#allocation6_spill]] %s2486_s29  ;;  %s2039_s21 = sadd.s32 4294967295, %s2514_s20   ;;  %s2514_s20 = sphi %s2627_s20, %s27_s20   ;;  %s2510_s19 = sphi %s2625_s19, %s3062_s19   ;;  %s2506_s18 = sphi %s2623_s18, %s3061_s18   ;;  %s2502_s17 = sphi %s2621_s17, %s3060_s17   ;;  %s2498_s16 = sphi %s2619_s16, %s3059_s16   ;;  %s2494_s15 = sphi %s2617_s15, %s3058_s15   ;;  %s2490_s30 = sphi %s2615_s30, %s3057_s30   ;;  %s2486_s29 = sphi %s2613_s29, %s3056_s29  }
   0xd   : > { %3022 = sst [smem:[#allocation7_spill]] %s2490_s30  ;;  %s2040_s22 = sadd.s32 4294967294, %s2514_s20  }
   0xe   : > { %3023 = sst [smem:[#allocation8_spill]] %s2494_s15  ;;  %s36_s23 = sadd.s32 1, %s2506_s18 }
   0xf   : > { %3024 = sst [smem:[#allocation9_spill]] %s2498_s16  ;;  %p37_p0 = scmp.ge.s32.totalorder %s36_s23, 2 }
  0x10   : > { %3025 = sst [smem:[#allocation10_spill]] %s2502_s17  ;;  %s39_s24 = sadd.s32 1, %s2510_s19 }
  0x11   : > { %3026 = sst [smem:[#allocation11_spill]] %s2506_s18  ;;  %p410_p1 = scmp.ne.s32.totalorder %s2494_s15, %s2490_s30 }
  0x12   : > { %3027 = sst [smem:[#allocation12_spill]] %s2510_s19  ;;  %p411_p2 = scmp.eq.s32.totalorder %s2039_s21, 3 }
  0x13   : > { %3028 = sst [smem:[#allocation13_spill]] %s2514_s20  ;;  %s3064_s23 = smov (%p37_p0, %s36_s23), 0 }
  0x14   : > { %3029 = sst [smem:[#allocation14_spill]] %s3064_s23  ;;  %s3066_s24 = smov (!%p37_p0, %s39_s24), %s2510_s19 }
  0x15   : > { %p2662_p3 = por %p411_p2, %p410_p1  ;;  %p416_p4 = scmp.ne.s32.totalorder %s2490_s30, %s2486_s29 }
  0x16   : > { %p41_p5 = scmp.ge.s32.totalorder %s3066_s24, 2  ;;  %p417_p6 = scmp.eq.s32.totalorder %s2040_s22, 3 }
  0x17   : > { %s3030_s25 = scalar_select %p2662_p3, 1, 0 }
  0x18   : > { %p2043_p7 = scmp.ge.s32.totalorder %s2514_s20, 1  ;;  %p522_p8 = scmp.lt.s32.totalorder %s2514_s20, 5 }
  0x19   : > { %3031 = sst [smem:[#allocation15_spill]] %s3030_s25  ;;  %s3068_s24 = smov (%p41_p5, %s3066_s24), 0 }
  0x1a   : > { %3032 = sst [smem:[#allocation16_spill]] %s3068_s24  ;;  %p2672_p9 = por %p417_p6, %p416_p4 }
  0x1b   : > { %p523_p10 = pnand %p2043_p7, %p522_p8  ;;  %s397_s27 = ssub.s32 %s2510_s19, %s3068_s24 }
  0x1c   : > { %s3033_s26 = scalar_select %p2672_p9, 1, 0 }
  0x1d   : > { %s400_s28 = sadd.s32 1, %s2494_s15  ;;  %p398_p11 = scmp.eq.s32.totalorder %s397_s27, 0 }
  0x1e   : > { %3034 = sst [smem:[#allocation17_spill]] %s3033_s26  ;;  %526 = sbr.rel (%p523_p10) target bundleno = 2775 (0xad7), region = 76 }
  0x1f   : > { %s2680_s21 = scalar_select %p398_p11, %s2494_s15, %s400_s28  }
  0x20   : > { %s3002_s22 = sand.u32 (!%p523_p10), 1, %s2490_s30   ;;  %p608_p12 = scmp.lt.s32.totalorder (!%p523_p10), %s2502_s17, 1 }
  0x21   : > { %3035 = sst [smem:[#allocation18_spill]] %s2680_s21  ;;  %s2686_s23 = sshll.u32 (!%p523_p10), %s3002_s22, 3 }
  0x22   : > { %p612_p13 = scmp.lt.s32.totalorder (!%p523_p10), %s2498_s16, 1  ;;  %s3036_s0 = sld [smem:[#allocation19_spill]] (!%p523_p10) }
  0x23   : > { %s3037_s3 = sld [smem:[#allocation20_spill]] (!%p523_p10)  ;;  %s3038_s4 = sld [smem:[#allocation21_spill]] (!%p523_p10) }
  0x24   : > { %s607_s20 = scalar_lea.vmem (!%p523_p10), [#allocation3], %s2686_s23  ;;  %s3039_s15 = sld [smem:[#allocation9_spill]] (!%p523_p10) }
  0x25   : > { %s609_s18 = scalar_select %p608_p12, %s2502_s17, 1 }
  0x26   : > { %s2691_s26 = scalar_select %p612_p13, %s2498_s16, 1 }
  0x27   : > { %s2045_s27 = sshll.u32 %s609_s18, 3 }
  0x28   : > { %s611_s22 = scalar_lea.vmem %s3036_s0, %s2045_s27  ;;  %s2084_s25 = sshll.u32 %s2691_s26, 5 }
  0x29   : > { %s2708_s13 = scalar_lea.vmem %s3037_s3, %s2084_s25  ;;  %s2713_s16 = scalar_lea.vmem %s3038_s4, %s2084_s25 }
  0x2a   : > { %s633_s29 = scalar_lea.vmem %s2990_s6, %s2691_s26  ;;  %s2730_s0 = scalar_lea.vmem %s2992_s8, %s2084_s25 }
  0x2b   : > { %s644_s3 = scalar_lea.vmem %s2993_s9, %s2691_s26  ;;  %s2087_s4 = sshll.u32 %s2691_s26, 7 }
  0x2c   : > { %s2740_s19 = scalar_lea.vmem %s2994_s10, %s2087_s4  ;;  %s652_s14 = scalar_lea.vmem %s2995_s11, %s2691_s26 }
  0x2d   : > { %p2054_p0 = scmp.ne.s32.totalorder %s3039_s15, 0 }
  0x2e   : > { %v657_v0 = vld [vmem:[%s611_s22] sm:$0xff] (!%p2054_p0)  ;;  %vm658_vm0 = vcmask (!%p2054_p0), 261120  }
  0x2f   : > { %656 = sbr.rel (%p2054_p0) target bundleno = 54 (0x36), region = 80  ;;  %659 = vst.msk [vmem:[#allocation2] sm:$0xff] (!%p2054_p0), %vm658_vm0, %v657_v0 }
  0x36 PF: > { %v2748_v1 = vld [vmem:[#allocation2] sm:$0xff]  ;;  %vm663_vm1 = vcmask 261120   ;;  %v693_v9 = vld [vmem:[%s2708_s13 + $0x8] sm:$0xff]  ;;  %v694_v10 = vld [vmem:[%s2708_s13 + $0x10] sm:$0xff]  ;;  %v2516_v11 = vmov 0.0|0.0   ;;  %vm2517_vm2 = vmmov 0   ;;  %s3040_s15 = scalar_lea.vmem %s2985_s1, %s2691_s26  ;;  %s3041_s30 = scalar_lea.vmem %s2986_s2, %s2691_s26  ;;  %v769_v34 = vlaneseq }
  0x37   : > { %v664_v2 = vsel %vm663_vm1, %v2748_v1, 0.0  ;;  %v692_v8 = vld [vmem:[%s2708_s13] sm:$0xff]  ;;  %2260 = vmatprep.subr.bf16.mxu1 %v2516_v11  ;;  %v695_v13 = vld [vmem:[%s2708_s13 + $0x18] sm:$0xff]  ;;  %v2518_v14 = vmov 0.0   ;;  %s2519_s17 = smov 120   ;;  %s2520_s12 = smov 96  }
  0x38   : > { %665 = vadd.xlane.f32.xlu0 %v664_v2  ;;  %v2261_v12 = vpack.c.bf16 %v693_v9, %v692_v8  ;;  %2149 = vmatprep.mubr.msk.f32.mxu1 %vm2517_vm2, %v2518_v14  ;;  %v2264_v15 = vpack.c.bf16 %v695_v13, %v694_v10  ;;  %v2055_v20 = vld [vmem:[%s3040_s15] ss:$0 sm:$0xff]  ;;  %s2521_s18 = smov 88   ;;  %s2522_s24 = smov 80   ;;  %vm778_vm3 = vcmask 64512   ;;  %v770_v35 = vshrl.u32 %v769_v34, 7 }
  0x39   : > { %2162 = vmatprep.subr.mxu0 %v2518_v14  ;;  %2164 = vmatprep.mubr.msk.f32.mxu0 %vm2517_vm2, %v2518_v14  ;;  %v2056_v22 = vld [vmem:[%s3041_s30] ss:$0 sm:$0xff]  ;;  %s2523_s27 = smov 112   ;;  %s2524_s21 = smov 72   ;;  %v772_v36 = vand.u32 127, %v769_v34  ;;  %vm1456_vm5 = vcmask 130048  }
  0x3a   : > { %2262 = vmatpush3.bf16.msra.mxu1 %v2261_v12  ;;  %s2525_s28 = smov 104   ;;  %v2526_v38 = vmov -1e+30   ;;  %s2527_s4 = smov 64   ;;  %v1460_v34 = vld [vmem:[%s2713_s16] sm:$0xff]  ;;  %vm1458_vm6 = vcmask 195584  }
  0x3b   : > { %2263 = vmatprep.subr.bf16.mxu1 %v2516_v11  ;;  %vm773_vm4 = vcmp.le.s32.totalorder %v772_v36, %v770_v35  ;;  %s2528_s13 = smov 48   ;;  %s2529_s15 = smov 40   ;;  %v1461_v35 = vld [vmem:[%s2713_s16 + $0x8] sm:$0xff] }
  0x3c   : > { %v774_v39 = vsel %vm773_vm4, 0.0, %v2526_v38  ;;  %s2530_s25 = smov 56   ;;  %v2267_v36 = vpack.c.bf16 %v1461_v35, %v1460_v34  ;;  %s2531_s22 = smov 8  }
  0x3d   : > { %s2532_s30 = smov 16  }
  0x3e   : > { %2265 = vmatpush3.bf16.msra.mxu1 %v2264_v15 }
  0x3f   : > { %2152 = vmatprep.subr.mxu1 %v2518_v14 }
  0xc5   : > { %v666_v3 = vpop.xlane.xlu0 %665 }
  0xc6   : > { %v668_v4 = vmul.f32 0.03125, %v666_v3 }
  0xc8   : > { %v669_v5 = vsub.f32 %v2748_v1, %v668_v4 }
  0xca   : > { %v670_v6 = vmul.f32 %v669_v5, %v669_v5 }
  0xcc   : > { %v671_v7 = vsel %vm663_vm1, %v670_v6, 0.0 }
  0xcd   : > { %672 = vadd.xlane.f32.xlu0 %v671_v7 }
 0x15a   : > { %v673_v16 = vpop.xlane.xlu0 %672 }
 0x15b   : > { %v674_v17 = vmul.f32 0.03125, %v673_v16 }
 0x15d   : > { %v675_v18 = vadd.f32 1e-05, %v674_v17 }
 0x15f   : > { %2400 = vrsqrt.f32 %v675_v18 }
 0x169   : > { %v2401_v19 = vpop.eup %2400 }
 0x16a   : > { %v677_v21 = vmul.f32 %v2401_v19, %v669_v5 }
 0x16c   : > { %v684_v23 = vmul.f32 %v2055_v20, %v677_v21 }
 0x16e   : > { %v691_v24 = vadd.f32 %v2056_v22, %v684_v23 }
 0x170   : > { %2150 = vmatmul.mubr.msk.f32.vlgmr.msra.gmra.mrb[0].mxu1 %vm663_vm1, %v691_v24 }
 0x171   : > { %2154 = vmatprep.mubr.msk.f32.mxu1 %vm2517_vm2, %v2518_v14 }
 0x243   : > { %v2779_v25 = vpop.f32.mrb[0].mxu1 }
 0x244   : > { %942 = vrot.lane.b32.xlu0 %v2779_v25, %s2519_s17  ;;  %776 = vrot.lane.b32.xlu1 %v2779_v25, %s2520_s12  ;;  %v2151_v26 = vpop.f32.mrb[1].mxu1  ;;  %s2533_s17 = smov 24  }
 0x248   : > { %944 = vrot.lane.b32.xlu1 %v2779_v25, %s2521_s18  ;;  %s3042_s18 = scalar_lea.vmem %s2989_s5, %s2691_s26 }
 0x24c   : > { %1111 = vrot.lane.b32.xlu1 %v2779_v25, %s2522_s24 }
 0x250   : > { %1109 = vrot.lane.b32.xlu1 %v2779_v25, %s2523_s27 }
 0x254   : > { %1278 = vrot.lane.b32.xlu1 %v2779_v25, %s2524_s21 }
 0x258   : > { %1276 = vrot.lane.b32.xlu1 %v2779_v25, %s2525_s28  ;;  %s3043_s28 = scalar_lea.vmem %s2991_s7, %s2691_s26 }
 0x259   : > { %v2073_v35 = vld [vmem:[%s3043_s28] ss:$0 sm:$0xff] }
 0x2b6   : > { %v777_v27 = vpop.permute.xlu1 %776  ;;  %v943_v29 = vpop.permute.xlu0 %942 }
 0x2b7   : > { %2153 = vmatpush3.xpose.msk.msra.mxu1 %vm778_vm3, %v777_v27 }
 0x2b8   : > { %2157 = vmatprep.subr.mxu1 %v2518_v14 }
 0x2ba   : > { %2155 = vmatmul.mubr.msk.f32.vlgmr.msra.gmra.mrb[2].mxu1 %vm778_vm3, %v2779_v25  ;;  %v945_v28 = vpop.permute.xlu1 %944 }
 0x2bb   : > { %2163 = vmatpush3.xpose.msk.msra.mxu0 %vm778_vm3, %v945_v28  ;;  %2159 = vmatprep.mubr.msk.f32.mxu1 %vm2517_vm2, %v2518_v14 }
 0x2bc   : > { %2172 = vmatprep.subr.mxu0 %v2518_v14 }
 0x2be   : > { %2165 = vmatmul.mubr.msk.f32.vlgmr.msra.gmra.mrb[0].mxu0 %vm778_vm3, %v943_v29  ;;  %v1112_v30 = vpop.permute.xlu1 %1111 }
 0x2bf   : > { %2173 = vmatpush3.xpose.msk.msra.mxu0 %vm778_vm3, %v1112_v30  ;;  %2174 = vmatprep.mubr.msk.f32.mxu0 %vm2517_vm2, %v2518_v14 }
 0x2c0   : > { %2182 = vmatprep.subr.mxu0 %v2518_v14 }
 0x2c2   : > { %v1110_v31 = vpop.permute.xlu1 %1109 }
 0x2c3   : > { %2175 = vmatmul.mubr.msk.f32.vlgmr.msra.gmra.mrb[2].mxu0 %vm778_vm3, %v1110_v31 }
 0x2c4   : > { %2184 = vmatprep.mubr.msk.f32.mxu0 %vm2517_vm2, %v2518_v14 }
 0x2c6   : > { %v1279_v32 = vpop.permute.xlu1 %1278 }
 0x2c7   : > { %2183 = vmatpush3.xpose.msk.msra.mxu0 %vm778_vm3, %v1279_v32 }
 0x2c8   : > { %2278 = vmatprep.subr.bf16.mxu0 %v2516_v11 }
 0x2ca   : > { %v1277_v33 = vpop.permute.xlu1 %1276 }
 0x2cb   : > { %2185 = vmatmul.mubr.msk.f32.vlgmr.msra.gmra.mrb[4].mxu0 %vm778_vm3, %v1277_v33 }
 0x2cc   : > { %2246 = vmatprep.mubr.msk.f32.mxu0 %vm2517_vm2, %v2518_v14 }
 0x38d   : > { %v849_v37 = vpop.f32.mrb[2].mxu1 }
 0x38e   : > { %v853_v40 = vmul.f32 0.17677669, %v849_v37  ;;  %v2156_v41 = vpop.f32.mrb[3].mxu1 }
 0x390   : > { %v854_v42 = vadd.f32 %v853_v40, %v774_v39  ;;  %v1463_v40 = vld [vmem:[%s2713_s16 + $0x18] sm:$0xff] }
 0x391   : > { %v1016_v43 = vpop.f32.mrb[0].mxu0 }
 0x392   : > { %v1020_v44 = vmul.f32 0.17677669, %v1016_v43  ;;  %v2166_v45 = vpop.f32.mrb[1].mxu0  ;;  %v855_v46 = vsel %vm778_vm3, %v854_v42, -inf }
 0x393   : > { %856 = vmax.xlane.f32.xlu1 %v855_v46 }
 0x394   : > { %v1021_v47 = vadd.f32 %v1020_v44, %v774_v39 }
 0x396   : > { %v1183_v48 = vpop.f32.mrb[2].mxu0  ;;  %v1022_v49 = vsel %vm778_vm3, %v1021_v47, -inf }
 0x397   : > { %v1187_v50 = vmul.f32 0.17677669, %v1183_v48  ;;  %1023 = vmax.xlane.f32.xlu0 %v1022_v49  ;;  %v2176_v51 = vpop.f32.mrb[3].mxu0 }
 0x399   : > { %v1188_v52 = vadd.f32 %v1187_v50, %v774_v39 }
 0x39b   : > { %v1189_v53 = vsel %vm778_vm3, %v1188_v52, -inf }
 0x39c   : > { %1190 = vmax.xlane.f32.xlu1 %v1189_v53 }
 0x39e   : > { %v1350_v54 = vpop.f32.mrb[4].mxu0 }
 0x39f   : > { %v1354_v55 = vmul.f32 0.17677669, %v1350_v54  ;;  %v2186_v56 = vpop.f32.mrb[5].mxu0  ;;  %v2070_v54 = vld [vmem:[%s3042_s18] ss:$0 sm:$0xff] }
 0x3a1   : > { %v1355_v57 = vadd.f32 %v1354_v55, %v774_v39  ;;  %v1462_v39 = vld [vmem:[%s2713_s16 + $0x10] sm:$0xff] }
 0x3a2   : > { %v2270_v41 = vpack.c.bf16 %v1463_v40, %v1462_v39  ;;  %v2074_v40 = vld [vmem:[%s644_s3] ss:$0 sm:$0xff] }
 0x3a3   : > { %v1356_v58 = vsel %vm778_vm3, %v1355_v57, -inf }
 0x3a4   : > { %1357 = vmax.xlane.f32.xlu0 %v1356_v58 }
 0x3ad   : > { %866 = vrot.lane.b32.xlu1 %v2779_v25, %s2527_s4 }
 0x420   : > { %v857_v59 = vpop.xlane.xlu1 %856 }
 0x421   : > { %v858_v60 = vsub.f32 %v854_v42, %v857_v59 }
 0x423   : > { %v859_v61 = vmul.f32 1.442695, %v858_v60 }
 0x424   : > { %v1024_v62 = vpop.xlane.xlu0 %1023 }
 0x425   : > { %2402 = vpow2.f32 %v859_v61  ;;  %v1025_v63 = vsub.f32 %v1021_v47, %v1024_v62 }
 0x427   : > { %v1026_v0 = vmul.f32 1.442695, %v1025_v63 }
 0x429   : > { %2404 = vpow2.f32 %v1026_v0  ;;  %v1191_v2 = vpop.xlane.xlu1 %1190  ;;  %v1574_v0 = vld [vmem:[%s2730_s0] sm:$0xff] }
 0x42a   : > { %v1192_v3 = vsub.f32 %v1188_v52, %v1191_v2  ;;  %v1575_v2 = vld [vmem:[%s2730_s0 + $0x8] sm:$0xff] }
 0x42c   : > { %v1193_v4 = vmul.f32 1.442695, %v1192_v3  ;;  %v1576_v3 = vld [vmem:[%s2730_s0 + $0x10] sm:$0xff] }
 0x42d   : > { %v867_v5 = vpop.permute.xlu1 %866 }
 0x42e   : > { %2406 = vpow2.f32 %v1193_v4  ;;  %2158 = vmatpush3.msra.mxu1 %v867_v5  ;;  %v1577_v4 = vld [vmem:[%s2730_s0 + $0x18] sm:$0xff] }
 0x42f   : > { %v2403_v6 = vpop.eup %2402  ;;  %2167 = vmatprep.subr.mxu1 %v2518_v14  ;;  %v2276_v5 = vpack.c.bf16 %v1577_v4, %v1576_v3 }
 0x430   : > { %v861_v7 = vsel %vm778_vm3, %v2403_v6, 0.0 }
 0x431   : > { %v1358_v8 = vpop.xlane.xlu0 %1357  ;;  %862 = vadd.xlane.f32.xlu1 %v861_v7  ;;  %v1660_v7 = vld [vmem:[%s2740_s19 + $0x8] sm:$0xff] }
 0x432   : > { %v1359_v9 = vsub.f32 %v1355_v57, %v1358_v8  ;;  %v1661_v8 = vld [vmem:[%s2740_s19 + $0x10] sm:$0xff] }
 0x433   : > { %v2405_v10 = vpop.eup %2404 }
 0x434   : > { %v1360_v12 = vmul.f32 1.442695, %v1359_v9  ;;  %v1028_v13 = vsel %vm778_vm3, %v2405_v10, 0.0 }
 0x435   : > { %1029 = vadd.xlane.f32.xlu0 %v1028_v13  ;;  %v1663_v13 = vld [vmem:[%s2740_s19 + $0x20] sm:$0xff] }
 0x436   : > { %2408 = vpow2.f32 %v1360_v12 }
 0x438   : > { %v2407_v15 = vpop.eup %2406 }
 0x439   : > { %v1195_v16 = vsel %vm778_vm3, %v2407_v15, 0.0 }
 0x43a   : > { %1196 = vadd.xlane.f32.xlu1 %v1195_v16 }
 0x440   : > { %v2409_v17 = vpop.eup %2408 }
 0x441   : > { %v1362_v18 = vsel %vm778_vm3, %v2409_v17, 0.0 }
 0x442   : > { %1363 = vadd.xlane.f32.xlu0 %v1362_v18  ;;  %v1666_v18 = vld [vmem:[%s2740_s19 + $0x38] sm:$0xff] }
 0x44b   : > { %1200 = vrot.lane.b32.xlu1 %v2779_v25, %s2528_s13 }
 0x44f   : > { %1367 = vrot.lane.b32.xlu1 %v2779_v25, %s2529_s15 }
 0x458   : > { %1033 = vrot.lane.b32.xlu0 %v2779_v25, %s2530_s25 }
 0x4be   : > { %v863_v19 = vpop.xlane.xlu1 %862 }
 0x4bf   : > { %2410 = vrcp.f32 %v863_v19 }
 0x4c2   : > { %v1030_v20 = vpop.xlane.xlu0 %1029 }
 0x4c3   : > { %2412 = vrcp.f32 %v1030_v20  ;;  %v1667_v20 = vld [vmem:[%s2740_s19 + $0x40] sm:$0xff] }
 0x4c7   : > { %v1197_v21 = vpop.xlane.xlu1 %1196 }
 0x4c8   : > { %2414 = vrcp.f32 %v1197_v21  ;;  %v1668_v21 = vld [vmem:[%s2740_s19 + $0x48] sm:$0xff] }
 0x4c9   : > { %v2411_v22 = vpop.eup %2410 }
 0x4ca   : > { %v865_v23 = vmul.f32 %v2411_v22, %v2403_v6  ;;  %v1659_v6 = vld [vmem:[%s2740_s19] sm:$0xff]  ;;  %v2291_v22 = vpack.c.bf16 %v1668_v21, %v1667_v20 }
 0x4cb   : > { %v1201_v28 = vpop.permute.xlu1 %1200  ;;  %v2279_v9 = vpack.c.bf16 %v1660_v7, %v1659_v6 }
 0x4cc   : > { %2160 = vmatmul.mubr.msk.f32.vlgmr.msra.gmra.mrb[4].mxu1 %vm778_vm3, %v865_v23  ;;  %v1669_v23 = vld [vmem:[%s2740_s19 + $0x50] sm:$0xff] }
 0x4cd   : > { %2169 = vmatprep.mubr.msk.f32.mxu1 %vm2517_vm2, %v2518_v14  ;;  %v2413_v26 = vpop.eup %2412  ;;  %2280 = vmatpush3.bf16.msra.mxu0 %v2279_v9 }
 0x4ce   : > { %v1032_v27 = vmul.f32 %v2413_v26, %v2405_v10  ;;  %v1662_v10 = vld [vmem:[%s2740_s19 + $0x18] sm:$0xff]  ;;  %2281 = vmatprep.subr.bf16.mxu0 %v2516_v11 }
 0x4cf   : > { %v1364_v24 = vpop.xlane.xlu0 %1363  ;;  %v1368_v31 = vpop.permute.xlu1 %1367  ;;  %v2282_v12 = vpack.c.bf16 %v1662_v10, %v1661_v8 }
 0x4d0   : > { %2416 = vrcp.f32 %v1364_v24  ;;  %v1670_v24 = vld [vmem:[%s2740_s19 + $0x58] sm:$0xff] }
 0x4d1   : > { %2283 = vmatpush3.bf16.msra.mxu0 %v2282_v12  ;;  %v2294_v26 = vpack.c.bf16 %v1670_v24, %v1669_v23 }
 0x4d2   : > { %v2415_v25 = vpop.eup %2414  ;;  %2284 = vmatprep.subr.bf16.mxu0 %v2516_v11 }
 0x4d3   : > { %v1034_v29 = vpop.permute.xlu0 %1033  ;;  %v1199_v30 = vmul.f32 %v2415_v25, %v2407_v15  ;;  %v1664_v15 = vld [vmem:[%s2740_s19 + $0x28] sm:$0xff] }
 0x4d4   : > { %2168 = vmatpush3.msra.mxu1 %v1034_v29  ;;  %v2285_v16 = vpack.c.bf16 %v1664_v15, %v1663_v13 }
 0x4d5   : > { %2170 = vmatmul.mubr.msk.f32.vlgmr.msra.gmra.mrb[6].mxu1 %vm778_vm3, %v1032_v27  ;;  %2177 = vmatprep.subr.mxu1 %v2518_v14  ;;  %v1671_v27 = vld [vmem:[%s2740_s19 + $0x60] sm:$0xff] }
 0x4d6   : > { %2178 = vmatpush3.msra.mxu1 %v1201_v28  ;;  %2179 = vmatprep.mubr.msk.f32.mxu1 %vm2517_vm2, %v2518_v14  ;;  %v1672_v28 = vld [vmem:[%s2740_s19 + $0x68] sm:$0xff] }
 0x4d7   : > { %2187 = vmatprep.subr.mxu1 %v2518_v14  ;;  %2286 = vmatpush3.bf16.msra.mxu0 %v2285_v16  ;;  %v2297_v29 = vpack.c.bf16 %v1672_v28, %v1671_v27 }
 0x4d8   : > { %2287 = vmatprep.subr.bf16.mxu0 %v2516_v11 }
 0x4d9   : > { %2180 = vmatmul.mubr.msk.f32.vlgmr.msra.gmra.mrb[8].mxu1 %vm778_vm3, %v1199_v30 }
 0x4da   : > { %v2417_v32 = vpop.eup %2416  ;;  %2188 = vmatpush3.msra.mxu1 %v1368_v31  ;;  %2189 = vmatprep.mubr.msk.f32.mxu1 %vm2517_vm2, %v2518_v14 }
 0x4db   : > { %v1366_v33 = vmul.f32 %v2417_v32, %v2409_v17  ;;  %2266 = vmatprep.subr.bf16.mxu1 %v2516_v11  ;;  %v1665_v17 = vld [vmem:[%s2740_s19 + $0x30] sm:$0xff] }
 0x4dc   : > { %v2288_v19 = vpack.c.bf16 %v1666_v18, %v1665_v17 }
 0x4dd   : > { %2190 = vmatmul.mubr.msk.f32.vlgmr.msra.gmra.mrb[10].mxu1 %vm778_vm3, %v1366_v33  ;;  %v2072_v33 = vld [vmem:[%s633_s29] ss:$0 sm:$0xff] }
 0x4de   : > { %2200 = vmatprep.mubr.msk.f32.mxu1 %vm2517_vm2, %v2518_v14  ;;  %2268 = vmatpush3.bf16.msra.mxu1 %v2267_v36 }
 0x4df   : > { %2269 = vmatprep.subr.bf16.mxu1 %v2516_v11  ;;  %2289 = vmatpush3.bf16.msra.mxu0 %v2288_v19 }
 0x4e0   : > { %2290 = vmatprep.subr.bf16.mxu0 %v2516_v11 }
 0x4e2   : > { %2271 = vmatpush3.bf16.msra.mxu1 %v2270_v41 }
 0x4e3   : > { %2272 = vmatprep.subr.bf16.mxu1 %v2516_v11  ;;  %2292 = vmatpush3.bf16.msra.mxu0 %v2291_v22 }
 0x4e4   : > { %2293 = vmatprep.subr.bf16.mxu0 %v2516_v11 }
 0x4e7   : > { %2295 = vmatpush3.bf16.msra.mxu0 %v2294_v26 }
 0x4e8   : > { %2296 = vmatprep.subr.bf16.mxu0 %v2516_v11 }
 0x4eb   : > { %2298 = vmatpush3.bf16.msra.mxu0 %v2297_v29 }
 0x4ec   : > { %2299 = vmatprep.subr.bf16.mxu0 %v2516_v11 }
 0x59f   : > { %v938_v37 = vpop.f32.mrb[4].mxu1 }
 0x5a0   : > { %v2161_v38 = vpop.f32.mrb[5].mxu1 }
 0x5a1   : > { %v1674_v38 = vld [vmem:[%s2740_s19 + $0x78] sm:$0xff] }
 0x5a8   : > { %v1105_v42 = vpop.f32.mrb[6].mxu1 }
 0x5a9   : > { %1444 = vrot.lane.b32.xlu0 %v1105_v42, %s2531_s22  ;;  %v2171_v43 = vpop.f32.mrb[7].mxu1 }
 0x5ac   : > { %v1272_v44 = vpop.f32.mrb[8].mxu1 }
 0x5ad   : > { %1448 = vrot.lane.b32.xlu1 %v1272_v44, %s2532_s30  ;;  %v2181_v45 = vpop.f32.mrb[9].mxu1 }
 0x5b0   : > { %v1439_v46 = vpop.f32.mrb[10].mxu1 }
 0x5b1   : > { %1452 = vrot.lane.b32.xlu0 %v1439_v46, %s2533_s17  ;;  %v2191_v47 = vpop.f32.mrb[11].mxu1  ;;  %v2076_v46 = vld [vmem:[%s652_s14] ss:$0 sm:$0xff] }
 0x61b   : > { %v1445_v48 = vpop.permute.xlu0 %1444 }
 0x61c   : > { %v1455_v50 = vsel %vm778_vm3, %v938_v37, %v1445_v48  ;;  %v1673_v37 = vld [vmem:[%s2740_s19 + $0x70] sm:$0xff]  ;;  %s3044_s19 = sld [smem:[#allocation9_spill]] }
 0x61d   : > { %v2300_v39 = vpack.c.bf16 %v1674_v38, %v1673_v37 }
 0x61f   : > { %v1449_v49 = vpop.permute.xlu1 %1448  ;;  %2301 = vmatpush3.bf16.msra.mxu0 %v2300_v39 }
 0x620   : > { %v1457_v51 = vsel %vm1456_vm5, %v1455_v50, %v1449_v49 }
 0x622   : > { %p2077_p1 = scmp.ne.s32.totalorder %s3044_s19, 1 }
 0x623   : > { %v1453_v52 = vpop.permute.xlu0 %1452  ;;  %s3045_s22 = sld [smem:[#allocation22_spill]] (!%p2077_p1)  ;;  %vm2535_vm7 = vmmov (!%p2077_p1), 0   ;;  %s3046_s24 = sld [smem:[#allocation23_spill]] (!%p2077_p1) }
 0x624   : > { %v1459_v53 = vsel %vm1458_vm6, %v1457_v51, %v1453_v52 }
 0x625   : > { %2201 = vmatmul.mubr.msk.f32.vlgmr.msra.gmra.mrb[12].mxu1 %vm663_vm1, %v1459_v53  ;;  %v2534_v53 = vmov (!%p2077_p1), 0.0|0.0  }
 0x626   : > { %2211 = vmatprep.mubr.msk.f32.mxu1 %vm2517_vm2, %v2518_v14  ;;  %2302 = vmatprep.subr.bf16.mxu0 (!%p2077_p1), %v2534_v53 }
 0x629   : > { %v1759_v50 = vld [vmem:[%s3045_s22] sm:$0xff] (!%p2077_p1)  ;;  %v1760_v51 = vld [vmem:[%s3045_s22 + $0x8] sm:$0xff] (!%p2077_p1)  ;;  %v1761_v52 = vld [vmem:[%s3045_s22 + $0x10] sm:$0xff] (!%p2077_p1) }
 0x6f8   : > { %v1540_v55 = vpop.f32.mrb[12].mxu1 }
 0x6f9   : > { %v1541_v56 = vadd.f32 %v2070_v54, %v1540_v55  ;;  %v2202_v57 = vpop.f32.mrb[13].mxu1  ;;  %v2303_v54 = vpack.c.bf16 (!%p2077_p1), %v1760_v51, %v1759_v50  ;;  %v1762_v55 = vld [vmem:[%s3045_s22 + $0x18] sm:$0xff] (!%p2077_p1) }
 0x6fa   : > { %v2306_v57 = vpack.c.bf16 (!%p2077_p1), %v1762_v55, %v1761_v52 }
 0x6fb   : > { %v2853_v58 = vadd.f32 %v1541_v56, %v2748_v1  ;;  %v2273_v1 = vpack.c.bf16 %v1575_v2, %v1574_v0  ;;  %v2536_v56 = vmov (!%p2077_p1), 0.0  }
 0x6fd   : > { %v1547_v59 = vsel %vm663_vm1, %v2853_v58, 0.0  ;;  %2274 = vmatpush3.bf16.msra.mxu1 %v2273_v1 }
 0x6fe   : > { %1548 = vadd.xlane.f32.xlu1 %v1547_v59  ;;  %2275 = vmatprep.subr.bf16.mxu1 %v2516_v11 }
 0x701   : > { %2277 = vmatpush3.bf16.msra.mxu1 %v2276_v5 }
 0x78b   : > { %v1549_v60 = vpop.xlane.xlu1 %1548 }
 0x78c   : > { %v1550_v14 = vmul.f32 0.03125, %v1549_v60 }
 0x78e   : > { %v1551_v61 = vsub.f32 %v2853_v58, %v1550_v14 }
 0x790   : > { %v1552_v62 = vmul.f32 %v1551_v61, %v1551_v61 }
 0x792   : > { %v1553_v63 = vsel %vm663_vm1, %v1552_v62, 0.0 }
 0x793   : > { %1554 = vadd.xlane.f32.xlu0 %v1553_v63 }
 0x820   : > { %v1555_v25 = vpop.xlane.xlu0 %1554 }
 0x821   : > { %v1556_v30 = vmul.f32 0.03125, %v1555_v25 }
 0x823   : > { %v1557_v31 = vadd.f32 1e-05, %v1556_v30 }
 0x825   : > { %2418 = vrsqrt.f32 %v1557_v31 }
 0x82f   : > { %v2419_v32 = vpop.eup %2418 }
 0x830   : > { %v1559_v34 = vmul.f32 %v2419_v32, %v1551_v61 }
 0x832   : > { %v1566_v36 = vmul.f32 %v2072_v33, %v1559_v34 }
 0x834   : > { %v1573_v11 = vadd.f32 %v2073_v35, %v1566_v36 }
 0x836   : > { %2212 = vmatmul.mubr.msk.f32.vlgmr.msra.gmra.mrb[14].mxu1 %vm663_vm1, %v1573_v11 }
 0x909   : > { %v1654_v41 = vpop.f32.mrb[14].mxu1 }
 0x90a   : > { %v1655_v42 = vadd.f32 %v2074_v40, %v1654_v41  ;;  %v2213_v43 = vpop.f32.mrb[15].mxu1 }
 0x90c   : > { %v1658_v44 = vmax.f32 %v1655_v42, 0.0 }
 0x90e   : > { %2247 = vmatmul.mubr.f32.vlgmr.msra.gmra.mrb[6].mxu0 %v1658_v44 }
 0x90f   : > { %2257 = vmatprep.mubr.msk.f32.mxu0 (!%p2077_p1), %vm2535_vm7, %v2536_v56  ;;  %2304 = vmatpush3.bf16.msra.mxu0 (!%p2077_p1), %v2303_v54 }
 0x910   : > { %2305 = vmatprep.subr.bf16.mxu0 (!%p2077_p1), %v2534_v53 }
 0x913   : > { %2307 = vmatpush3.bf16.msra.mxu0 (!%p2077_p1), %v2306_v57 }
 0x9e0   : > { %1758 = sbr.rel (%p2077_p1) target bundleno = 2749 (0xabd), region = 84 }
 0x9e1   : > { %v1741_v45 = vpop.f32.mrb[6].mxu0 }
 0x9e2   : > { %v1745_v47 = vadd.f32 %v1741_v45, %v2853_v58  ;;  %v2248_v48 = vpop.f32.mrb[7].mxu0  ;;  %v2078_v58 = vld [vmem:[%s3046_s24] ss:$0 sm:$0xff] (!%p2077_p1) }
 0x9e4   : > { %v1753_v49 = vadd.f32 %v2076_v46, %v1745_v47 }
 0x9e6   : > { %1754 = vst.msk [vmem:[#allocation2] sm:$0xff] %vm663_vm1, %v1753_v49  ;;  %2258 = vmatmul.mubr.msk.f32.vlgmr.msra.gmra.mrb[0].mxu0 (!%p2077_p1), %vm663_vm1, %v1753_v49 }
 0xab9   : > { %v1839_v59 = vpop.f32.mrb[0].mxu0 }
 0xaba   : > { %v1840_v60 = vadd.f32 %v2078_v58, %v1839_v59  ;;  %v2259_v14 = vpop.f32.mrb[1].mxu0 }
 0xabc   : > { %1843 = vst [vmem:[%s607_s20] sm:$0xff] %v1840_v60 }
 0xabd PF: > { %s3047_s27 = sld [smem:[#allocation10_spill]]  ;;  %s3048_s21 = sld [smem:[#allocation7_spill]] }
 0xabe   : > { %s3050_s15 = sld [smem:[#allocation24_spill]]  ;;  %s1858_s25 = sshll.u32 %s607_s20, 4  ;;  %s1859_s25 = int_to_ptr.vmem [resolvable:$true] %s1858_s25 }
 0xabf   : > { %s2420_s16 = scalar_lea.vmem %s1859_s25, 128  ;;  %s2537_s26 = smov [#allocation3]  }
 0xac0   : > { %p2421_p2 = scmp.ne.s32.totalorder %s1859_s25, %s2420_s16  ;;  %s2424_s14 = sshll.u32 %s2537_s26, 4  ;;  %s2425_s14 = int_to_ptr.vmem [resolvable:$false] %s2424_s14 }
 0xac1   : > { %s2426_s12 = scalar_lea.vmem %s2425_s14, 256  ;;  %p2427_p6 = scmp.lt.s32.totalorder %s1859_s25, %s2425_s14 }
 0xac2   : > { %p2422_p4 = pnand %p2421_p2, %p2662_p3  ;;  %p2428_p7 = scmp.lt.s32.totalorder %s2426_s12, %s2420_s16 }
 0xac3   : > { %s2081_s4 = sshll.u32 %s3047_s27, 7  ;;  %s3052_s30 = sand.u32 1, %s3048_s21  }
 0xac4   : > { %s3051_s3 = smov %s3050_s15  ;;  %s2933_s19 = scalar_lea.hbm %s3050_s15, %s2081_s4 }
 0xac5   : > { %s1845_s17 = scalar_lea.sflag [#allocation4], %s3052_s30  ;;  %p2423_p5 = pneg %p2422_p4 }
 0xac6   : > { %p2429_p8 = por %p2428_p7, %p2427_p6 }
 0xac8   : > { %p2430_p10 = pnand %p2429_p8, %p2423_p5 }
 0xaca   : > { %2433 = shalt.err (!%p2430_p10)
}
 0xacb   : > { %s2434_s23 = scalar_lea.hbm %s2933_s19, 128  ;;  %s2438_s0 = scalar_lea.hbm %s3051_s3, 256 }
 0xacc   : > { %p2435_p11 = scmp.ne.s32.totalorder %s2933_s19, %s2434_s23  ;;  %p2439_p0 = scmp.lt.u32.totalorder %s2933_s19, %s3051_s3 }
 0xacd   : > { %p2440_p1 = scmp.lt.u32.totalorder %s2438_s0, %s2434_s23  ;;  %p2442_p4 = scmp.lt.u32.totalorder %s2434_s23, %s2933_s19 }
 0xace   : > { %p2436_p12 = pnand %p2435_p11, %p2662_p3 }
 0xacf   : > { %p2441_p2 = por %p2440_p1, %p2439_p0 }
 0xad0   : > { %p2437_p13 = pneg %p2436_p12 }
 0xad1   : > { %p2443_p5 = por %p2442_p4, %p2441_p2 }
 0xad3   : > { %p2444_p6 = pnand %p2443_p5, %p2437_p13 }
 0xad5   : > { %2447 = shalt.err (!%p2444_p6)
}
 0xad6   : > { %2308 = dma.vmem_to_hbm [thread:$0]  (%p2662_p3), %s1859_s25, 128, %s2933_s19, %s1845_s17  }
 0xad7 PF: > { %s3053_s21 = sld [smem:[#allocation13_spill]]  ;;  %s3054_s4 = sld [smem:[#allocation6_spill]] }
 0xadd   : > { %p2314_p7 = scmp.ge.s32.totalorder %s3053_s21, 2  ;;  %s1870_s29 = sand.u32 1, %s3054_s4  }
 0xade   : > { %s1871_s15 = scalar_lea.sflag [#allocation4], %s1870_s29 }
 0xadf   : > { %p2311_p8 = pnand %p2314_p7, %p2672_p9 }
 0xae1   : > { %2481 = dma.done.wait (!%p2311_p8), %s1871_s15, 128  }
 0xae2   : > { %2483 = vsyncadd (!%p2311_p8), %s1871_s15, 4294967168  ;;  %s27_s20 = sadd.s32 1, %s3053_s21   ;;  %s3056_s29 = sld [smem:[#allocation7_spill]] }
 0xae3   : > { %p24_p10 = scmp.ge.s32.totalorder %s27_s20, 6   ;;  %s3057_s30 = sld [smem:[#allocation8_spill]] }
 0xae4   : > { %s3058_s15 = sld [smem:[#allocation18_spill]]  ;;  %s3059_s16 = sld [smem:[#allocation11_spill]] }
 0xae5   : > { %s3060_s17 = sld [smem:[#allocation12_spill]]  ;;  %s3061_s18 = sld [smem:[#allocation14_spill]] }
 0xae6   : > { %s3062_s19 = sld [smem:[#allocation16_spill]]  ;;  %26 = sbr.rel (!%p24_p10) target bundleno = 12 (0xc), region = 152 }
 0xaed   :  { %1876 = vsyncpa [#allocation4], 1 }
 0xaee   :  { %1878 = vsyncpa [#allocation4 + $0x1], 1 }

</bundles_post_ra>
